<compile_context>
chip_gen: v6e
topology: v6e:2x2x1
jax: 0.10.0
libtpu: 0.0.40
codegen_flags: <defaults>
</compile_context>

<pallas_src>
import math
from functools import partial

import jax
import jax.numpy as jnp
from jax.experimental import pallas as pl
from jax.experimental.pallas import tpu as pltpu


# ---------------------------------------------------------------------------
# Kernel: one row-tile of  y = leaky_relu(z @ W_z + h @ W_h + b_eff)
# ---------------------------------------------------------------------------
def cat_multi_attn_kernel(z_ref, h_ref, wz_ref, wh_ref, b_ref, o_ref):
    # Two small GEMMs (MXU) accumulate in f32; epilogue (bias + LeakyReLU) on VPU.
    acc = jnp.dot(z_ref[...], wz_ref[...], preferred_element_type=jnp.float32)
    acc += jnp.dot(h_ref[...], wh_ref[...], preferred_element_type=jnp.float32)
    y = acc + b_ref[...]
    o_ref[...] = jnp.where(y > 0, y, jnp.float32(0.01) * y).astype(o_ref.dtype)


# ---------------------------------------------------------------------------
# Wrapper: algebraic fold of (V-proj -> out_proj -> Linear), row tiling.
# ---------------------------------------------------------------------------
def _pick_tile_n(n_rows, tile_n=None):
    if tile_n is None:
        # Per-generation guidance: large tiles amortize the ~0.35us/step grid
        # overhead; keep smaller on 64 MiB-VMEM chips (v7x), larger on v6e.
        tile_n = 1024
        try:
            if pltpu.get_tpu_info().vmem_capacity_bytes <= 64 * 1024 * 1024:
                tile_n = 512
        except Exception:
            pass
    padded_rows = max(8, -(-n_rows // 8) * 8)   # sublane multiple
    return min(tile_n, padded_rows)


def cat_multi_attn(z, h, params, *, num_heads, tile_n=None,
                   compute_dtype=jnp.float32):
    N, Dz = z.shape
    Nh, Dh = h.shape
    assert Nh == N
    E = Dz + Dh
    assert E % num_heads == 0        # only place num_heads matters (seq_len == 1)
    O = params["lin_b"].shape[0]

    # --- fold weights once, in the wrapper, at highest precision -----------
    hp = jax.lax.Precision.HIGHEST
    wv_t = params["in_proj_w"][2 * E:, :].T.astype(jnp.float32)    # (E, E)  V slice only
    wo_t = params["out_proj_w"].T.astype(jnp.float32)              # (E, E)
    wl_t = params["lin_w"].T.astype(jnp.float32)                   # (E, O)
    w_eff = jnp.dot(jnp.dot(wv_t, wo_t, precision=hp), wl_t, precision=hp)   # (E, O)

    b_v = params["in_proj_b"][2 * E:].astype(jnp.float32)
    b_eff = (jnp.dot(jnp.dot(b_v, wo_t, precision=hp) + params["out_proj_b"],
                     wl_t, precision=hp) + params["lin_b"])[None, :]         # (1, O)
    b_eff = b_eff.astype(jnp.float32)

    # Split the folded weight so z and h never need to be concatenated in HBM.
    w_z = w_eff[:Dz, :].astype(compute_dtype)                      # (Dz, O)
    w_h = w_eff[Dz:, :].astype(compute_dtype)                      # (Dh, O)
    z_c = z.astype(compute_dtype)
    h_c = h.astype(compute_dtype)

    # --- row-tiled grid -----------------------------------------------------
    tn = _pick_tile_n(N, tile_n)
    grid = (pl.cdiv(N, tn),)

    in_specs = [
        pl.BlockSpec((tn, Dz), lambda i: (i, 0)),        # z tile (streams)
        pl.BlockSpec((tn, Dh), lambda i: (i, 0)),        # h tile (streams)
        pl.BlockSpec((Dz, O), lambda i: (0, 0)),         # weights stay resident
        pl.BlockSpec((Dh, O), lambda i: (0, 0)),
        pl.BlockSpec((1, O), lambda i: (0, 0)),          # fused bias
    ]
    out_specs = pl.BlockSpec((tn, O), lambda i: (i, 0))

    return pl.pallas_call(
        cat_multi_attn_kernel,
        out_shape=jax.ShapeDtypeStruct((N, O), jnp.float32),
        grid=grid,
        in_specs=in_specs,
        out_specs=out_specs,
        compiler_params=pltpu.CompilerParams(
            dimension_semantics=("parallel",)),          # shard rows across TCs
    )(z_c, h_c, w_z, w_h, b_eff)


# ---------------------------------------------------------------------------
# Pure-JAX reference mirroring the PyTorch forward (seq_len == 1, unfused).
# ---------------------------------------------------------------------------
def cat_multi_attn_ref(z, h, params):
    x = jnp.concatenate([z, h], axis=1)
    E = x.shape[1]
    # seq_len == 1 -> softmax over a single key is exactly 1.0 -> attn == V.
    v = x @ params["in_proj_w"][2 * E:, :].T + params["in_proj_b"][2 * E:]
    attn_out = v @ params["out_proj_w"].T + params["out_proj_b"]
    y = attn_out @ params["lin_w"].T + params["lin_b"]
    return jnp.where(y > 0, y, 0.01 * y)


def init_params(key, embedding, output):
    ks = jax.random.split(key, 6)
    s = 1.0 / math.sqrt(embedding)
    return {
        "in_proj_w": jax.random.uniform(ks[0], (3 * embedding, embedding),
                                        jnp.float32, -s, s),
        "in_proj_b": jax.random.uniform(ks[1], (3 * embedding,),
                                        jnp.float32, -s, s),
        "out_proj_w": jax.random.uniform(ks[2], (embedding, embedding),
                                         jnp.float32, -s, s),
        "out_proj_b": jnp.zeros((embedding,), jnp.float32),
        "lin_w": jax.random.uniform(ks[3], (output, embedding),
                                    jnp.float32, -s, s),
        "lin_b": jax.random.uniform(ks[4], (output,), jnp.float32, -s, s),
    }


if __name__ == "__main__":
    embedding, num_heads, output = 32, 4, 16
    n_tokens = 256                       # small, but exercises a multi-step grid

    key = jax.random.PRNGKey(0)
    kz, kh, kp = jax.random.split(key, 3)
    z = jax.random.normal(kz, (n_tokens, embedding // 2), jnp.float32)
    h = jax.random.normal(kh, (n_tokens, embedding // 2), jnp.float32)
    params = init_params(kp, embedding, output)

    ref = cat_multi_attn_ref(z, h, params)

    # f32 path (tile_n=128 -> grid of 2 row tiles)
    out = cat_multi_attn(z, h, params, num_heads=num_heads, tile_n=128)
    out = jax.block_until_ready(out)
    assert out.shape == (n_tokens, output)
    assert jnp.allclose(out, ref, atol=1e-4, rtol=1e-4), \
        float(jnp.max(jnp.abs(out - ref)))

    # bf16-operand variant: halves DMA bytes, f32 accumulation + f32 epilogue.
    out_bf16 = jax.block_until_ready(
        cat_multi_attn(z, h, params, num_heads=num_heads, tile_n=128,
                       compute_dtype=jnp.bfloat16))
    assert jnp.allclose(out_bf16, ref, atol=5e-2, rtol=5e-2)

    print("KERNEL_OK")
</pallas_src>

<mosaic_0001>
module attributes {stable_mosaic.version = 11 : i64} {
  func.func @cat_multi_attn_kernel(%arg0: i32, %arg1: memref<128x16xf32, #tpu.memory_space<vmem>>, %arg2: memref<128x16xf32, #tpu.memory_space<vmem>>, %arg3: memref<16x16xf32, #tpu.memory_space<vmem>>, %arg4: memref<16x16xf32, #tpu.memory_space<vmem>>, %arg5: memref<1x16xf32, #tpu.memory_space<vmem>>, %arg6: memref<128x16xf32, #tpu.memory_space<vmem>>) attributes {dimension_semantics = [#tpu.dimension_semantics<parallel>], iteration_bounds = array<i64: 2>, scalar_prefetch = 0 : i64, scratch_operands = 0 : i64, tpu.core_type = #tpu.core_type<tc>, window_params = [{transform_indices = @transform_0, window_bounds = array<i64: 128, 16>}, {transform_indices = @transform_1, window_bounds = array<i64: 128, 16>}, {pipeline_mode = #tpu.pipeline_mode<synchronous>, transform_indices = @transform_2, window_bounds = array<i64: 16, 16>}, {pipeline_mode = #tpu.pipeline_mode<synchronous>, transform_indices = @transform_3, window_bounds = array<i64: 16, 16>}, {pipeline_mode = #tpu.pipeline_mode<synchronous>, transform_indices = @transform_4, window_bounds = array<i64: 1, 16>}, {transform_indices = @transform_5, window_bounds = array<i64: 128, 16>}]} {
    %c0 = arith.constant 0 : index
    %c0_0 = arith.constant 0 : index
    %0 = vector.load %arg1[%c0, %c0_0] : memref<128x16xf32, #tpu.memory_space<vmem>>, vector<128x16xf32>
    %c0_1 = arith.constant 0 : index
    %c0_2 = arith.constant 0 : index
    %1 = vector.load %arg3[%c0_1, %c0_2] : memref<16x16xf32, #tpu.memory_space<vmem>>, vector<16x16xf32>
    %cst = arith.constant dense<0.000000e+00> : vector<128x16xf32>
    %2 = tpu.matmul %0, %1, %cst {dimension_numbers = #tpu.dot_dimension_numbers<[1], [0], [0], [1], [0, 0, 1, 1], [], []>} : vector<128x16xf32>, vector<16x16xf32>, vector<128x16xf32> -> vector<128x16xf32>
    %c0_3 = arith.constant 0 : index
    %c0_4 = arith.constant 0 : index
    %3 = vector.load %arg2[%c0_3, %c0_4] : memref<128x16xf32, #tpu.memory_space<vmem>>, vector<128x16xf32>
    %c0_5 = arith.constant 0 : index
    %c0_6 = arith.constant 0 : index
    %4 = vector.load %arg4[%c0_5, %c0_6] : memref<16x16xf32, #tpu.memory_space<vmem>>, vector<16x16xf32>
    %cst_7 = arith.constant dense<0.000000e+00> : vector<128x16xf32>
    %5 = tpu.matmul %3, %4, %cst_7 {dimension_numbers = #tpu.dot_dimension_numbers<[1], [0], [0], [1], [0, 0, 1, 1], [], []>} : vector<128x16xf32>, vector<16x16xf32>, vector<128x16xf32> -> vector<128x16xf32>
    %6 = arith.addf %2, %5 : vector<128x16xf32>
    %c0_8 = arith.constant 0 : index
    %c0_9 = arith.constant 0 : index
    %7 = vector.load %arg5[%c0_8, %c0_9] : memref<1x16xf32, #tpu.memory_space<vmem>>, vector<1x16xf32>
    %8 = vector.broadcast %7 : vector<1x16xf32> to vector<128x16xf32>
    %9 = arith.addf %6, %8 : vector<128x16xf32>
    %cst_10 = arith.constant 0.000000e+00 : f32
    %10 = vector.broadcast %cst_10 : f32 to vector<128x16xf32>
    %11 = arith.cmpf ogt, %9, %10 : vector<128x16xf32>
    %cst_11 = arith.constant 0.00999999977 : f32
    %12 = vector.broadcast %cst_11 : f32 to vector<128x16xf32>
    %13 = arith.mulf %12, %9 : vector<128x16xf32>
    %14 = arith.select %11, %9, %13 : vector<128x16xi1>, vector<128x16xf32>
    %c0_12 = arith.constant 0 : index
    %c0_13 = arith.constant 0 : index
    %15 = vector.load %arg6[%c0_12, %c0_13] : memref<128x16xf32, #tpu.memory_space<vmem>>, vector<128x16xf32>
    tpu.vector_store %arg6[%c0_12, %c0_13], %14 {strides = array<i32>} : memref<128x16xf32, #tpu.memory_space<vmem>>, vector<128x16xf32>,
    return
  }
  func.func @transform_0(%arg0: i32) -> (i32, i32) {
    %c0_i32 = arith.constant 0 : i32
    %c0_i32_0 = arith.constant 0 : i32
    return %arg0, %c0_i32 : i32, i32
  }
  func.func @transform_1(%arg0: i32) -> (i32, i32) {
    %c0_i32 = arith.constant 0 : i32
    %c0_i32_0 = arith.constant 0 : i32
    return %arg0, %c0_i32 : i32, i32
  }
  func.func @transform_2(%arg0: i32) -> (i32, i32) {
    %c0_i32 = arith.constant 0 : i32
    %c0_i32_0 = arith.constant 0 : i32
    %c0_i32_1 = arith.constant 0 : i32
    return %c0_i32, %c0_i32_0 : i32, i32
  }
  func.func @transform_3(%arg0: i32) -> (i32, i32) {
    %c0_i32 = arith.constant 0 : i32
    %c0_i32_0 = arith.constant 0 : i32
    %c0_i32_1 = arith.constant 0 : i32
    return %c0_i32, %c0_i32_0 : i32, i32
  }
  func.func @transform_4(%arg0: i32) -> (i32, i32) {
    %c0_i32 = arith.constant 0 : i32
    %c0_i32_0 = arith.constant 0 : i32
    %c0_i32_1 = arith.constant 0 : i32
    return %c0_i32, %c0_i32_0 : i32, i32
  }
  func.func @transform_5(%arg0: i32) -> (i32, i32) {
    %c0_i32 = arith.constant 0 : i32
    %c0_i32_0 = arith.constant 0 : i32
    return %arg0, %c0_i32 : i32, i32
  }
}

</mosaic_0001>

<bundles_post_ra>
// kernel: tpu_custom_call.1
= control target key start
LH: loop header
LB: loop body
LE: loop exit
PB: predicated region body
PF: predicated region fallthrough
CT: control target
= control target key end

     0   :  { %s1012_s18 = smov 0   ;;  %s1172_s0 = inlined_call_operand.vmem [shape: f32[256,16], index: 0, kind: input, shape index: {}]   ;;  %s1173_s1 = inlined_call_operand.vmem [shape: f32[256,16], index: 1, kind: input, shape index: {}]   ;;  %s1174_s2 = inlined_call_operand.vmem [shape: f32[16,16], index: 2, kind: input, shape index: {}]   ;;  %s1175_s3 = inlined_call_operand.vmem [shape: f32[16,16], index: 3, kind: input, shape index: {}]   ;;  %s1176_s4 = inlined_call_operand.vmem [shape: f32[1,16], index: 4, kind: input, shape index: {}]   ;;  %s1177_s5 = inlined_call_operand.vmem [shape: f32[256,16], index: 5, kind: output, shape index: {}]  }
   0x1 LB: > { %s828_s19 = sadd.s32 4294967295, %s980_s18   ;;  %p832_p0 = scmp.ge.s32.totalorder %s980_s18, 1  ;;  %s980_s18 = sphi %s1012_s18, %s15_s18  }
   0x2   : > { %p199_p1 = scmp.lt.s32.totalorder %s980_s18, 3 }
   0x4   : > { %p200_p2 = pnand %p832_p0, %p199_p1 }
   0x5   : > { %s833_s26 = sshll.u32 (!%p200_p2), %s828_s19, 4 }
   0x6   : > { %203 = sbr.rel (%p200_p2) target bundleno = 250 (0xfa), region = 40  ;;  %p233_p3 = scmp.lt.s32.totalorder (!%p200_p2), %s833_s26, 31 }
   0xb   : > { %v285_v0 = vld [vmem:[%s1175_s3 + $0x8] sm:$0xff]  ;;  %v284_v2 = vld [vmem:[%s1175_s3] sm:$0xff]  ;;  %s1179_s26 = smov (!%p233_p3, %s833_s26), 31  ;;  %vm286_vm0 = vcmask 130048  }
   0xc   : > { %v267_v1 = vld [vmem:[%s1174_s2 + $0x8] sm:$0xff]  ;;  %910 = vmatprep.subr.mxu0 %v285_v0  ;;  %v266_v3 = vld [vmem:[%s1174_s2] sm:$0xff]  ;;  %s1032_s29 = sshll.u32 %s1179_s26, 3 }
   0xd   : > { %938 = vmatprep.subr.mxu1 %v267_v1  ;;  %911 = vmatpush3.msra.mxu0 %v285_v0  ;;  %s1038_s7 = scalar_lea.vmem %s1173_s1, %s1032_s29  ;;  %s1045_s10 = scalar_lea.vmem %s1172_s0, %s1032_s29  ;;  %v1113_v38 = vld [vmem:[%s1176_s4] ss:$0 sm:$0xff] }
   0xe   : > { %939 = vmatpush3.msra.mxu1 %v267_v1  ;;  %912 = vmatprep.subr.mxu0 %v284_v2  ;;  %v268_v4 = vld [vmem:[%s1038_s7] sm:$0xff]  ;;  %v269_v5 = vld [vmem:[%s1038_s7 + $0x8] sm:$0xff]  ;;  %v270_v6 = vld [vmem:[%s1038_s7 + $0x10] sm:$0xff]  ;;  %s1120_s15 = scalar_lea.vmem %s1177_s5, %s1032_s29 }
   0xf   : > { %940 = vmatprep.subr.mxu1 %v266_v3  ;;  %913 = vmatpush3.msra.mxu0 %v284_v2  ;;  %v250_v7 = vld [vmem:[%s1045_s10] sm:$0xff]  ;;  %v251_v8 = vld [vmem:[%s1045_s10 + $0x8] sm:$0xff]  ;;  %v252_v9 = vld [vmem:[%s1045_s10 + $0x10] sm:$0xff] }
  0x10   : > { %941 = vmatpush3.msra.mxu1 %v266_v3  ;;  %914 = vmatprep.mubr.msk.f32.mxu0 %vm286_vm0, %v268_v4  ;;  %v271_v10 = vld [vmem:[%s1038_s7 + $0x18] sm:$0xff]  ;;  %v272_v12 = vld [vmem:[%s1038_s7 + $0x20] sm:$0xff]  ;;  %v273_v14 = vld [vmem:[%s1038_s7 + $0x28] sm:$0xff] }
  0x11   : > { %942 = vmatprep.mubr.msk.f32.mxu1 %vm286_vm0, %v250_v7  ;;  %915 = vmatmul.mubr.msk.f32.vlgmr.msra.gmra.mxu0 %vm286_vm0, %v269_v5  ;;  %v253_v11 = vld [vmem:[%s1045_s10 + $0x18] sm:$0xff]  ;;  %v254_v13 = vld [vmem:[%s1045_s10 + $0x20] sm:$0xff]  ;;  %v255_v15 = vld [vmem:[%s1045_s10 + $0x28] sm:$0xff] }
  0x12   : > { %943 = vmatmul.mubr.msk.f32.vlgmr.msra.gmra.mxu1 %vm286_vm0, %v251_v8  ;;  %917 = vmatprep.mubr.msk.f32.mxu0 %vm286_vm0, %v270_v6  ;;  %v274_v16 = vld [vmem:[%s1038_s7 + $0x30] sm:$0xff]  ;;  %v275_v18 = vld [vmem:[%s1038_s7 + $0x38] sm:$0xff]  ;;  %v276_v20 = vld [vmem:[%s1038_s7 + $0x40] sm:$0xff] }
  0x13   : > { %945 = vmatprep.mubr.msk.f32.mxu1 %vm286_vm0, %v252_v9  ;;  %v256_v17 = vld [vmem:[%s1045_s10 + $0x30] sm:$0xff]  ;;  %v257_v19 = vld [vmem:[%s1045_s10 + $0x38] sm:$0xff]  ;;  %v258_v21 = vld [vmem:[%s1045_s10 + $0x40] sm:$0xff] }
  0x14   : > { %v277_v22 = vld [vmem:[%s1038_s7 + $0x48] sm:$0xff]  ;;  %v278_v24 = vld [vmem:[%s1038_s7 + $0x50] sm:$0xff]  ;;  %v279_v26 = vld [vmem:[%s1038_s7 + $0x58] sm:$0xff] }
  0x15   : > { %918 = vmatmul.mubr.msk.f32.gmra.mxu0 %vm286_vm0, %v271_v10  ;;  %v259_v23 = vld [vmem:[%s1045_s10 + $0x48] sm:$0xff]  ;;  %v260_v25 = vld [vmem:[%s1045_s10 + $0x50] sm:$0xff]  ;;  %v261_v27 = vld [vmem:[%s1045_s10 + $0x58] sm:$0xff] }
  0x16   : > { %946 = vmatmul.mubr.msk.f32.gmra.mxu1 %vm286_vm0, %v253_v11  ;;  %920 = vmatprep.mubr.msk.f32.mxu0 %vm286_vm0, %v272_v12  ;;  %v280_v28 = vld [vmem:[%s1038_s7 + $0x60] sm:$0xff]  ;;  %v281_v30 = vld [vmem:[%s1038_s7 + $0x68] sm:$0xff]  ;;  %v282_v32 = vld [vmem:[%s1038_s7 + $0x70] sm:$0xff] }
  0x17   : > { %948 = vmatprep.mubr.msk.f32.mxu1 %vm286_vm0, %v254_v13  ;;  %v262_v29 = vld [vmem:[%s1045_s10 + $0x60] sm:$0xff]  ;;  %v263_v31 = vld [vmem:[%s1045_s10 + $0x68] sm:$0xff]  ;;  %v264_v33 = vld [vmem:[%s1045_s10 + $0x70] sm:$0xff] }
  0x18   : > { %v283_v34 = vld [vmem:[%s1038_s7 + $0x78] sm:$0xff] }
  0x19   : > { %921 = vmatmul.mubr.msk.f32.gmra.mxu0 %vm286_vm0, %v273_v14  ;;  %v265_v35 = vld [vmem:[%s1045_s10 + $0x78] sm:$0xff] }
  0x1a   : > { %949 = vmatmul.mubr.msk.f32.gmra.mxu1 %vm286_vm0, %v255_v15  ;;  %923 = vmatprep.mubr.msk.f32.mxu0 %vm286_vm0, %v274_v16 }
  0x1b   : > { %951 = vmatprep.mubr.msk.f32.mxu1 %vm286_vm0, %v256_v17 }
  0x1d   : > { %924 = vmatmul.mubr.msk.f32.gmra.mxu0 %vm286_vm0, %v275_v18 }
  0x1e   : > { %952 = vmatmul.mubr.msk.f32.gmra.mxu1 %vm286_vm0, %v257_v19  ;;  %926 = vmatprep.mubr.msk.f32.mxu0 %vm286_vm0, %v276_v20 }
  0x1f   : > { %954 = vmatprep.mubr.msk.f32.mxu1 %vm286_vm0, %v258_v21 }
  0x21   : > { %927 = vmatmul.mubr.msk.f32.gmra.mxu0 %vm286_vm0, %v277_v22 }
  0x22   : > { %955 = vmatmul.mubr.msk.f32.gmra.mxu1 %vm286_vm0, %v259_v23  ;;  %929 = vmatprep.mubr.msk.f32.mxu0 %vm286_vm0, %v278_v24 }
  0x23   : > { %957 = vmatprep.mubr.msk.f32.mxu1 %vm286_vm0, %v260_v25 }
  0x25   : > { %930 = vmatmul.mubr.msk.f32.gmra.mxu0 %vm286_vm0, %v279_v26 }
  0x26   : > { %958 = vmatmul.mubr.msk.f32.gmra.mxu1 %vm286_vm0, %v261_v27  ;;  %932 = vmatprep.mubr.msk.f32.mxu0 %vm286_vm0, %v280_v28 }
  0x27   : > { %960 = vmatprep.mubr.msk.f32.mxu1 %vm286_vm0, %v262_v29 }
  0x29   : > { %933 = vmatmul.mubr.msk.f32.gmra.mxu0 %vm286_vm0, %v281_v30 }
  0x2a   : > { %961 = vmatmul.mubr.msk.f32.gmra.mxu1 %vm286_vm0, %v263_v31  ;;  %935 = vmatprep.mubr.msk.f32.mxu0 %vm286_vm0, %v282_v32 }
  0x2b   : > { %963 = vmatprep.mubr.msk.f32.mxu1 %vm286_vm0, %v264_v33 }
  0x2d   : > { %936 = vmatmul.mubr.msk.f32.gmra.mxu0 %vm286_vm0, %v283_v34 }
  0x2e   : > { %964 = vmatmul.mubr.msk.f32.gmra.mxu1 %vm286_vm0, %v265_v35 }
  0xd1   : > { %v916_v36 = vpop.f32.mrf.mxu0 }
  0xd2   : > { %v944_v37 = vpop.f32.mrf.mxu1 }
  0xd3   : > { %v600_v39 = vadd.f32 %v944_v37, %v916_v36  ;;  %v401_v40 = vpop.f32.mrf.mxu0 }
  0xd4   : > { %v594_v41 = vpop.f32.mrf.mxu1 }
  0xd5   : > { %v681_v42 = vadd.f32 %v1113_v38, %v600_v39  ;;  %v595_v43 = vadd.f32 %v594_v41, %v401_v40  ;;  %v919_v44 = vpop.f32.mrf.mxu0 }
  0xd6   : > { %v947_v45 = vpop.f32.mrf.mxu1 }
  0xd7   : > { %vm697_vm1 = vcmp.gt.f32.partialorder %v681_v42, 0.0  ;;  %v713_v46 = vmul.f32 0.01, %v681_v42  ;;  %v680_v47 = vadd.f32 %v1113_v38, %v595_v43  ;;  %v610_v48 = vadd.f32 %v947_v45, %v919_v44  ;;  %v411_v49 = vpop.f32.mrf.mxu0 }
  0xd8   : > { %v604_v50 = vpop.f32.mrf.mxu1 }
  0xd9   : > { %v729_v51 = vsel %vm697_vm1, %v681_v42, %v713_v46  ;;  %vm696_vm2 = vcmp.gt.f32.partialorder %v680_v47, 0.0  ;;  %v712_v52 = vmul.f32 0.01, %v680_v47  ;;  %v683_v53 = vadd.f32 %v1113_v38, %v610_v48  ;;  %v922_v54 = vpop.f32.mrf.mxu0 }
  0xda   : > { %745 = vst.msk [vmem:[%s1120_s15 + $0x8] sm:$0xff] %vm286_vm0, %v729_v51  ;;  %v605_v55 = vadd.f32 %v604_v50, %v411_v49  ;;  %v950_v56 = vpop.f32.mrf.mxu1 }
  0xdb   : > { %v728_v57 = vsel %vm696_vm2, %v680_v47, %v712_v52  ;;  %vm699_vm3 = vcmp.gt.f32.partialorder %v683_v53, 0.0  ;;  %v715_v58 = vmul.f32 0.01, %v683_v53  ;;  %v620_v59 = vadd.f32 %v950_v56, %v922_v54  ;;  %v421_v60 = vpop.f32.mrf.mxu0 }
  0xdc   : > { %744 = vst.msk [vmem:[%s1120_s15] sm:$0xff] %vm286_vm0, %v728_v57  ;;  %v682_v61 = vadd.f32 %v1113_v38, %v605_v55  ;;  %v614_v62 = vpop.f32.mrf.mxu1 }
  0xdd   : > { %v731_v63 = vsel %vm699_vm3, %v683_v53, %v715_v58  ;;  %v685_v0 = vadd.f32 %v1113_v38, %v620_v59  ;;  %v615_v1 = vadd.f32 %v614_v62, %v421_v60  ;;  %v925_v2 = vpop.f32.mrf.mxu0 }
  0xde   : > { %747 = vst.msk [vmem:[%s1120_s15 + $0x18] sm:$0xff] %vm286_vm0, %v731_v63  ;;  %vm698_vm4 = vcmp.gt.f32.partialorder %v682_v61, 0.0  ;;  %v714_v3 = vmul.f32 0.01, %v682_v61  ;;  %v953_v4 = vpop.f32.mrf.mxu1 }
  0xdf   : > { %vm701_vm5 = vcmp.gt.f32.partialorder %v685_v0, 0.0  ;;  %v717_v5 = vmul.f32 0.01, %v685_v0  ;;  %v684_v6 = vadd.f32 %v1113_v38, %v615_v1  ;;  %v630_v7 = vadd.f32 %v953_v4, %v925_v2  ;;  %v431_v8 = vpop.f32.mrf.mxu0 }
  0xe0   : > { %v730_v9 = vsel %vm698_vm4, %v682_v61, %v714_v3  ;;  %v624_v10 = vpop.f32.mrf.mxu1 }
  0xe1   : > { %746 = vst.msk [vmem:[%s1120_s15 + $0x10] sm:$0xff] %vm286_vm0, %v730_v9  ;;  %v733_v11 = vsel %vm701_vm5, %v685_v0, %v717_v5  ;;  %vm700_vm6 = vcmp.gt.f32.partialorder %v684_v6, 0.0  ;;  %v716_v12 = vmul.f32 0.01, %v684_v6  ;;  %v687_v13 = vadd.f32 %v1113_v38, %v630_v7  ;;  %v928_v14 = vpop.f32.mrf.mxu0 }
  0xe2   : > { %749 = vst.msk [vmem:[%s1120_s15 + $0x28] sm:$0xff] %vm286_vm0, %v733_v11  ;;  %v625_v15 = vadd.f32 %v624_v10, %v431_v8  ;;  %v956_v16 = vpop.f32.mrf.mxu1 }
  0xe3   : > { %v732_v17 = vsel %vm700_vm6, %v684_v6, %v716_v12  ;;  %vm703_vm7 = vcmp.gt.f32.partialorder %v687_v13, 0.0  ;;  %v719_v18 = vmul.f32 0.01, %v687_v13  ;;  %v640_v19 = vadd.f32 %v956_v16, %v928_v14  ;;  %v441_v20 = vpop.f32.mrf.mxu0 }
  0xe4   : > { %748 = vst.msk [vmem:[%s1120_s15 + $0x20] sm:$0xff] %vm286_vm0, %v732_v17  ;;  %v686_v21 = vadd.f32 %v1113_v38, %v625_v15  ;;  %v634_v22 = vpop.f32.mrf.mxu1 }
  0xe5   : > { %v735_v23 = vsel %vm703_vm7, %v687_v13, %v719_v18  ;;  %v689_v24 = vadd.f32 %v1113_v38, %v640_v19  ;;  %v635_v25 = vadd.f32 %v634_v22, %v441_v20  ;;  %v931_v26 = vpop.f32.mrf.mxu0 }
  0xe6   : > { %751 = vst.msk [vmem:[%s1120_s15 + $0x38] sm:$0xff] %vm286_vm0, %v735_v23  ;;  %vm702_vm8 = vcmp.gt.f32.partialorder %v686_v21, 0.0  ;;  %v718_v27 = vmul.f32 0.01, %v686_v21  ;;  %v959_v28 = vpop.f32.mrf.mxu1 }
  0xe7   : > { %vm705_vm9 = vcmp.gt.f32.partialorder %v689_v24, 0.0  ;;  %v721_v29 = vmul.f32 0.01, %v689_v24  ;;  %v688_v30 = vadd.f32 %v1113_v38, %v635_v25  ;;  %v650_v31 = vadd.f32 %v959_v28, %v931_v26  ;;  %v451_v32 = vpop.f32.mrf.mxu0 }
  0xe8   : > { %v734_v33 = vsel %vm702_vm8, %v686_v21, %v718_v27  ;;  %v644_v34 = vpop.f32.mrf.mxu1 }
  0xe9   : > { %750 = vst.msk [vmem:[%s1120_s15 + $0x30] sm:$0xff] %vm286_vm0, %v734_v33  ;;  %v737_v35 = vsel %vm705_vm9, %v689_v24, %v721_v29  ;;  %vm704_vm10 = vcmp.gt.f32.partialorder %v688_v30, 0.0  ;;  %v720_v36 = vmul.f32 0.01, %v688_v30  ;;  %v691_v37 = vadd.f32 %v1113_v38, %v650_v31  ;;  %v934_v39 = vpop.f32.mrf.mxu0 }
  0xea   : > { %753 = vst.msk [vmem:[%s1120_s15 + $0x48] sm:$0xff] %vm286_vm0, %v737_v35  ;;  %v645_v40 = vadd.f32 %v644_v34, %v451_v32  ;;  %v962_v41 = vpop.f32.mrf.mxu1 }
  0xeb   : > { %v736_v42 = vsel %vm704_vm10, %v688_v30, %v720_v36  ;;  %vm707_vm11 = vcmp.gt.f32.partialorder %v691_v37, 0.0  ;;  %v723_v43 = vmul.f32 0.01, %v691_v37  ;;  %v660_v44 = vadd.f32 %v962_v41, %v934_v39  ;;  %v461_v45 = vpop.f32.mrf.mxu0 }
  0xec   : > { %752 = vst.msk [vmem:[%s1120_s15 + $0x40] sm:$0xff] %vm286_vm0, %v736_v42  ;;  %v690_v46 = vadd.f32 %v1113_v38, %v645_v40  ;;  %v654_v47 = vpop.f32.mrf.mxu1 }
  0xed   : > { %v739_v48 = vsel %vm707_vm11, %v691_v37, %v723_v43  ;;  %v693_v49 = vadd.f32 %v1113_v38, %v660_v44  ;;  %v655_v50 = vadd.f32 %v654_v47, %v461_v45  ;;  %v937_v51 = vpop.f32.mrf.mxu0 }
  0xee   : > { %755 = vst.msk [vmem:[%s1120_s15 + $0x58] sm:$0xff] %vm286_vm0, %v739_v48  ;;  %vm706_vm12 = vcmp.gt.f32.partialorder %v690_v46, 0.0  ;;  %v722_v52 = vmul.f32 0.01, %v690_v46  ;;  %v965_v53 = vpop.f32.mrf.mxu1 }
  0xef   : > { %vm709_vm13 = vcmp.gt.f32.partialorder %v693_v49, 0.0  ;;  %v725_v54 = vmul.f32 0.01, %v693_v49  ;;  %v692_v55 = vadd.f32 %v1113_v38, %v655_v50  ;;  %v670_v56 = vadd.f32 %v965_v53, %v937_v51  ;;  %v471_v57 = vpop.f32.mrf.mxu0 }
  0xf0   : > { %v738_v58 = vsel %vm706_vm12, %v690_v46, %v722_v52  ;;  %v664_v59 = vpop.f32.mrf.mxu1 }
  0xf1   : > { %754 = vst.msk [vmem:[%s1120_s15 + $0x50] sm:$0xff] %vm286_vm0, %v738_v58  ;;  %v741_v60 = vsel %vm709_vm13, %v693_v49, %v725_v54  ;;  %vm708_vm14 = vcmp.gt.f32.partialorder %v692_v55, 0.0  ;;  %v724_v61 = vmul.f32 0.01, %v692_v55  ;;  %v695_v62 = vadd.f32 %v1113_v38, %v670_v56 }
  0xf2   : > { %757 = vst.msk [vmem:[%s1120_s15 + $0x68] sm:$0xff] %vm286_vm0, %v741_v60  ;;  %v665_v63 = vadd.f32 %v664_v59, %v471_v57 }
  0xf3   : > { %v740_v0 = vsel %vm708_vm14, %v692_v55, %v724_v61  ;;  %vm711_vm15 = vcmp.gt.f32.partialorder %v695_v62, 0.0  ;;  %v727_v1 = vmul.f32 0.01, %v695_v62 }
  0xf4   : > { %756 = vst.msk [vmem:[%s1120_s15 + $0x60] sm:$0xff] %vm286_vm0, %v740_v0  ;;  %v694_v2 = vadd.f32 %v1113_v38, %v665_v63 }
  0xf5   : > { %v743_v3 = vsel %vm711_vm15, %v695_v62, %v727_v1 }
  0xf6   : > { %759 = vst.msk [vmem:[%s1120_s15 + $0x78] sm:$0xff] %vm286_vm0, %v743_v3  ;;  %vm710_vm1 = vcmp.gt.f32.partialorder %v694_v2, 0.0  ;;  %v726_v4 = vmul.f32 0.01, %v694_v2 }
  0xf8   : > { %v742_v5 = vsel %vm710_vm1, %v694_v2, %v726_v4 }
  0xf9   : > { %758 = vst.msk [vmem:[%s1120_s15 + $0x70] sm:$0xff] %vm286_vm0, %v742_v5 }
  0xfa PF: > { %s15_s18 = sadd.s32 1, %s980_s18  }
  0xfb   : > { %p12_p4 = scmp.ge.s32.totalorder %s15_s18, 4  }
  0xfd   :  { %14 = sbr.rel (!%p12_p4) target bundleno = 1 (0x1), region = 73 }

</bundles_post_ra>
